<compile_context>
chip_gen: v6e
topology: v6e:2x2x1
jax: 0.10.0
libtpu: 0.0.40
codegen_flags: <defaults>
</compile_context>

<pallas_src>
import functools

import jax
import jax.numpy as jnp
from jax.experimental import pallas as pl
from jax.experimental.pallas import tpu as pltpu

NEG_SLOPE = 0.01  # F.leaky_relu default negative_slope


def _leaky_relu(x):
    return jnp.where(x > 0, x, NEG_SLOPE * x)


def _round_up(n, m):
    return ((n + m - 1) // m) * m


# --------------------------------------------------------------------------
# Kernel: one batch tile through all four layers; weights stay VMEM-resident.
# --------------------------------------------------------------------------
def mlp_kernel(x_ref,
               w1_ref, b1_ref,
               w2_ref, b2_ref,
               w3_ref, b3_ref,
               w4_ref, b4_ref,
               o_ref):
    h = x_ref[...]  # bf16 (TB, K_pad)

    h = jnp.dot(h, w1_ref[...], preferred_element_type=jnp.float32) + b1_ref[...]
    h = _leaky_relu(h).astype(jnp.bfloat16)

    h = jnp.dot(h, w2_ref[...], preferred_element_type=jnp.float32) + b2_ref[...]
    h = _leaky_relu(h).astype(jnp.bfloat16)

    h = jnp.dot(h, w3_ref[...], preferred_element_type=jnp.float32) + b3_ref[...]
    h = _leaky_relu(h).astype(jnp.bfloat16)

    h = jnp.dot(h, w4_ref[...], preferred_element_type=jnp.float32) + b4_ref[...]

    o_ref[...] = h.astype(o_ref.dtype)  # bf16 store (lane-dense, unmasked)


# --------------------------------------------------------------------------
# One-time parameter preparation (do NOT call this per forward pass).
# --------------------------------------------------------------------------
def prepare_params(params):
    """Pad feature dims up to multiples of 128 lanes and cast weights to bf16.

    Weights -> bf16 (in_pad, out_pad); biases -> f32 (1, out_pad) rows.
    Zero-padding is exact: leaky_relu(0) = 0 and zero rows/cols contribute 0.
    """
    K, H = params["w1"].shape
    O = params["w4"].shape[1]
    K_pad, H_pad, O_pad = (_round_up(d, 128) for d in (K, H, O))

    def pad_w(w, rows, cols):
        w = w.astype(jnp.bfloat16)
        return jnp.pad(w, ((0, rows - w.shape[0]), (0, cols - w.shape[1])))

    def pad_b(b, cols):
        b = b.astype(jnp.float32)[None, :]
        return jnp.pad(b, ((0, 0), (0, cols - b.shape[1])))

    return {
        "w1": pad_w(params["w1"], K_pad, H_pad), "b1": pad_b(params["b1"], H_pad),
        "w2": pad_w(params["w2"], H_pad, H_pad), "b2": pad_b(params["b2"], H_pad),
        "w3": pad_w(params["w3"], H_pad, H_pad), "b3": pad_b(params["b3"], H_pad),
        "w4": pad_w(params["w4"], H_pad, O_pad), "b4": pad_b(params["b4"], O_pad),
    }


def _vmem_limit_bytes():
    # ~75% of physical VMEM: ~48 MiB on v7x (64 MiB), ~96 MiB on v5e/v6e (128 MiB).
    try:
        cap = int(pltpu.get_tpu_info().vmem_capacity_bytes)
    except Exception:
        cap = 64 * 1024 * 1024
    return int(cap * 3 // 4)


def _choose_tile_b(B, tile_b):
    """Batch tile: multiple of 16 (bf16 sublane packing); >=2 tiles if possible
    so v7x's two TensorCores both get work under the 'parallel' grid axis."""
    b16 = _round_up(B, 16)
    if b16 <= 16:
        return b16
    half = max(16, _round_up(b16 // 2, 16))
    return max(16, min(_round_up(tile_b, 16), half))


# --------------------------------------------------------------------------
# Forward pass wrapper.
# --------------------------------------------------------------------------
@functools.partial(jax.jit, static_argnames=("out_dim", "tile_b"))
def mlp_forward(x, padded_params, *, out_dim, tile_b=1024):
    """x: (B, input_size); padded_params: output of prepare_params()."""
    B, K = x.shape
    p = padded_params
    K_pad, H_pad = p["w1"].shape
    O_pad = p["w4"].shape[1]

    TB = _choose_tile_b(B, tile_b)
    B_pad = _round_up(B, TB)
    n_tiles = B_pad // TB

    # Only materialize a padded copy of x when actually needed; otherwise a
    # pure cast (or a no-op if the caller already supplies bf16).
    if B == B_pad and K == K_pad:
        x_p = x if x.dtype == jnp.bfloat16 else x.astype(jnp.bfloat16)
    else:
        x_p = jnp.pad(x.astype(jnp.bfloat16),
                      ((0, B_pad - B), (0, K_pad - K)))

    # Weights/biases: constant block index -> loaded once, VMEM-resident across
    # all batch tiles; single-buffered (double-buffering them wastes VMEM).
    def resident(shape):
        return pl.BlockSpec(shape, lambda i: (0, 0),
                            pipeline_mode=pl.Buffered(1))

    mm_elems = K_pad * H_pad + 2 * H_pad * H_pad + H_pad * O_pad
    flops = 2 * B_pad * mm_elems
    bytes_accessed = (
        2 * B_pad * K_pad            # x (bf16)
        + 2 * mm_elems               # weights (bf16)
        + 4 * (3 * H_pad + O_pad)    # biases (f32)
        + 2 * B_pad * O_pad          # output (bf16)
    )

    out_p = pl.pallas_call(
        mlp_kernel,
        out_shape=jax.ShapeDtypeStruct((B_pad, O_pad), jnp.bfloat16),
        grid=(n_tiles,),
        in_specs=[
            pl.BlockSpec((TB, K_pad), lambda i: (i, 0)),
            resident((K_pad, H_pad)), resident((1, H_pad)),
            resident((H_pad, H_pad)), resident((1, H_pad)),
            resident((H_pad, H_pad)), resident((1, H_pad)),
            resident((H_pad, O_pad)), resident((1, O_pad)),
        ],
        out_specs=pl.BlockSpec((TB, O_pad), lambda i: (i, 0)),
        compiler_params=pltpu.CompilerParams(
            dimension_semantics=("parallel",),
            vmem_limit_bytes=_vmem_limit_bytes(),
        ),
        cost_estimate=pl.CostEstimate(
            flops=flops, transcendentals=0, bytes_accessed=bytes_accessed),
    )(x_p, p["w1"], p["b1"], p["w2"], p["b2"],
      p["w3"], p["b3"], p["w4"], p["b4"])

    return out_p[:B, :out_dim]


# --------------------------------------------------------------------------
# Reference / init helpers (for the self-test).
# --------------------------------------------------------------------------
def init_params(key, input_size, hidden_dim, output_size):
    """Deterministic init mimicking torch.nn.Linear's U(-1/sqrt(fan_in), ...)."""
    dims = [(input_size, hidden_dim),
            (hidden_dim, hidden_dim),
            (hidden_dim, hidden_dim),
            (hidden_dim, output_size)]
    params = {}
    for i, (fan_in, fan_out) in enumerate(dims, start=1):
        key, kw, kb = jax.random.split(key, 3)
        bound = 1.0 / jnp.sqrt(float(fan_in))
        params[f"w{i}"] = jax.random.uniform(
            kw, (fan_in, fan_out), jnp.float32, -bound, bound)
        params[f"b{i}"] = jax.random.uniform(
            kb, (fan_out,), jnp.float32, -bound, bound)
    return params


def mlp_reference(x, params):
    h = x
    for i in (1, 2, 3):
        h = _leaky_relu(h @ params[f"w{i}"] + params[f"b{i}"])
    return h @ params["w4"] + params["b4"]


if __name__ == "__main__":
    input_size, hidden_dim, output_size = 16, 32, 8
    batch = 8

    key = jax.random.PRNGKey(0)
    key, kx = jax.random.split(key)
    x = jax.random.normal(kx, (batch, input_size), jnp.float32)
    params = init_params(key, input_size, hidden_dim, output_size)

    # One-time weight/bias preparation (padding + bf16 cast hoisted out of
    # the per-call path).
    padded = prepare_params(params)

    out = mlp_forward(x, padded, out_dim=output_size)
    out = jax.block_until_ready(out)
    ref = mlp_reference(x, params)
    assert out.shape == (batch, output_size)
    # bf16 MXU operands + bf16 output -> relaxed tolerance vs f32 reference.
    assert jnp.allclose(out.astype(jnp.float32), ref, atol=5e-2, rtol=5e-2), \
        f"max abs diff {jnp.max(jnp.abs(out.astype(jnp.float32) - ref))}"

    # Second check: non-aligned batch with multiple grid tiles (padding path).
    key, kx2 = jax.random.split(key)
    x2 = jax.random.normal(kx2, (200, input_size), jnp.float32)
    out2 = jax.block_until_ready(
        mlp_forward(x2, padded, out_dim=output_size, tile_b=64))
    ref2 = mlp_reference(x2, params)
    assert out2.shape == (200, output_size)
    assert jnp.allclose(out2.astype(jnp.float32), ref2, atol=5e-2, rtol=5e-2), \
        f"max abs diff {jnp.max(jnp.abs(out2.astype(jnp.float32) - ref2))}"

    print("KERNEL_OK")
</pallas_src>

<mosaic_0001>
module attributes {stable_mosaic.version = 11 : i64} {
  func.func @mlp_kernel(%arg0: i32, %arg1: memref<16x128xbf16, #tpu.memory_space<vmem>>, %arg2: memref<128x128xbf16, #tpu.memory_space<vmem>>, %arg3: memref<1x128xf32, #tpu.memory_space<vmem>>, %arg4: memref<128x128xbf16, #tpu.memory_space<vmem>>, %arg5: memref<1x128xf32, #tpu.memory_space<vmem>>, %arg6: memref<128x128xbf16, #tpu.memory_space<vmem>>, %arg7: memref<1x128xf32, #tpu.memory_space<vmem>>, %arg8: memref<128x128xbf16, #tpu.memory_space<vmem>>, %arg9: memref<1x128xf32, #tpu.memory_space<vmem>>, %arg10: memref<16x128xbf16, #tpu.memory_space<vmem>>) attributes {dimension_semantics = [#tpu.dimension_semantics<parallel>], iteration_bounds = array<i64: 1>, scalar_prefetch = 0 : i64, scratch_operands = 0 : i64, tpu.core_type = #tpu.core_type<tc>, window_params = [{transform_indices = @transform_0, window_bounds = array<i64: 16, 128>}, {pipeline_mode = #tpu.pipeline_mode<synchronous>, transform_indices = @transform_1, window_bounds = array<i64: 128, 128>}, {pipeline_mode = #tpu.pipeline_mode<synchronous>, transform_indices = @transform_2, window_bounds = array<i64: 1, 128>}, {pipeline_mode = #tpu.pipeline_mode<synchronous>, transform_indices = @transform_3, window_bounds = array<i64: 128, 128>}, {pipeline_mode = #tpu.pipeline_mode<synchronous>, transform_indices = @transform_4, window_bounds = array<i64: 1, 128>}, {pipeline_mode = #tpu.pipeline_mode<synchronous>, transform_indices = @transform_5, window_bounds = array<i64: 128, 128>}, {pipeline_mode = #tpu.pipeline_mode<synchronous>, transform_indices = @transform_6, window_bounds = array<i64: 1, 128>}, {pipeline_mode = #tpu.pipeline_mode<synchronous>, transform_indices = @transform_7, window_bounds = array<i64: 128, 128>}, {pipeline_mode = #tpu.pipeline_mode<synchronous>, transform_indices = @transform_8, window_bounds = array<i64: 1, 128>}, {transform_indices = @transform_9, window_bounds = array<i64: 16, 128>}]} {
    %c0 = arith.constant 0 : index
    %c0_0 = arith.constant 0 : index
    %0 = vector.load %arg1[%c0, %c0_0] : memref<16x128xbf16, #tpu.memory_space<vmem>>, vector<16x128xbf16>
    %c0_1 = arith.constant 0 : index
    %c0_2 = arith.constant 0 : index
    %1 = vector.load %arg2[%c0_1, %c0_2] : memref<128x128xbf16, #tpu.memory_space<vmem>>, vector<128x128xbf16>
    %cst = arith.constant dense<0.000000e+00> : vector<16x128xf32>
    %2 = tpu.matmul %0, %1, %cst {dimension_numbers = #tpu.dot_dimension_numbers<[1], [0], [0], [1], [0, 0, 1, 1], [], []>} : vector<16x128xbf16>, vector<128x128xbf16>, vector<16x128xf32> -> vector<16x128xf32>
    %c0_3 = arith.constant 0 : index
    %c0_4 = arith.constant 0 : index
    %3 = vector.load %arg3[%c0_3, %c0_4] : memref<1x128xf32, #tpu.memory_space<vmem>>, vector<1x128xf32>
    %4 = vector.broadcast %3 : vector<1x128xf32> to vector<16x128xf32>
    %5 = arith.addf %2, %4 : vector<16x128xf32>
    %cst_5 = arith.constant 0.000000e+00 : f32
    %6 = vector.broadcast %cst_5 : f32 to vector<16x128xf32>
    %7 = arith.cmpf ogt, %5, %6 : vector<16x128xf32>
    %cst_6 = arith.constant 0.00999999977 : f32
    %8 = vector.broadcast %cst_6 : f32 to vector<16x128xf32>
    %9 = arith.mulf %8, %5 : vector<16x128xf32>
    %10 = arith.select %7, %5, %9 : vector<16x128xi1>, vector<16x128xf32>
    %11 = arith.truncf %10 : vector<16x128xf32> to vector<16x128xbf16>
    %c0_7 = arith.constant 0 : index
    %c0_8 = arith.constant 0 : index
    %12 = vector.load %arg4[%c0_7, %c0_8] : memref<128x128xbf16, #tpu.memory_space<vmem>>, vector<128x128xbf16>
    %cst_9 = arith.constant dense<0.000000e+00> : vector<16x128xf32>
    %13 = tpu.matmul %11, %12, %cst_9 {dimension_numbers = #tpu.dot_dimension_numbers<[1], [0], [0], [1], [0, 0, 1, 1], [], []>} : vector<16x128xbf16>, vector<128x128xbf16>, vector<16x128xf32> -> vector<16x128xf32>
    %c0_10 = arith.constant 0 : index
    %c0_11 = arith.constant 0 : index
    %14 = vector.load %arg5[%c0_10, %c0_11] : memref<1x128xf32, #tpu.memory_space<vmem>>, vector<1x128xf32>
    %15 = vector.broadcast %14 : vector<1x128xf32> to vector<16x128xf32>
    %16 = arith.addf %13, %15 : vector<16x128xf32>
    %cst_12 = arith.constant 0.000000e+00 : f32
    %17 = vector.broadcast %cst_12 : f32 to vector<16x128xf32>
    %18 = arith.cmpf ogt, %16, %17 : vector<16x128xf32>
    %cst_13 = arith.constant 0.00999999977 : f32
    %19 = vector.broadcast %cst_13 : f32 to vector<16x128xf32>
    %20 = arith.mulf %19, %16 : vector<16x128xf32>
    %21 = arith.select %18, %16, %20 : vector<16x128xi1>, vector<16x128xf32>
    %22 = arith.truncf %21 : vector<16x128xf32> to vector<16x128xbf16>
    %c0_14 = arith.constant 0 : index
    %c0_15 = arith.constant 0 : index
    %23 = vector.load %arg6[%c0_14, %c0_15] : memref<128x128xbf16, #tpu.memory_space<vmem>>, vector<128x128xbf16>
    %cst_16 = arith.constant dense<0.000000e+00> : vector<16x128xf32>
    %24 = tpu.matmul %22, %23, %cst_16 {dimension_numbers = #tpu.dot_dimension_numbers<[1], [0], [0], [1], [0, 0, 1, 1], [], []>} : vector<16x128xbf16>, vector<128x128xbf16>, vector<16x128xf32> -> vector<16x128xf32>
    %c0_17 = arith.constant 0 : index
    %c0_18 = arith.constant 0 : index
    %25 = vector.load %arg7[%c0_17, %c0_18] : memref<1x128xf32, #tpu.memory_space<vmem>>, vector<1x128xf32>
    %26 = vector.broadcast %25 : vector<1x128xf32> to vector<16x128xf32>
    %27 = arith.addf %24, %26 : vector<16x128xf32>
    %cst_19 = arith.constant 0.000000e+00 : f32
    %28 = vector.broadcast %cst_19 : f32 to vector<16x128xf32>
    %29 = arith.cmpf ogt, %27, %28 : vector<16x128xf32>
    %cst_20 = arith.constant 0.00999999977 : f32
    %30 = vector.broadcast %cst_20 : f32 to vector<16x128xf32>
    %31 = arith.mulf %30, %27 : vector<16x128xf32>
    %32 = arith.select %29, %27, %31 : vector<16x128xi1>, vector<16x128xf32>
    %33 = arith.truncf %32 : vector<16x128xf32> to vector<16x128xbf16>
    %c0_21 = arith.constant 0 : index
    %c0_22 = arith.constant 0 : index
    %34 = vector.load %arg8[%c0_21, %c0_22] : memref<128x128xbf16, #tpu.memory_space<vmem>>, vector<128x128xbf16>
    %cst_23 = arith.constant dense<0.000000e+00> : vector<16x128xf32>
    %35 = tpu.matmul %33, %34, %cst_23 {dimension_numbers = #tpu.dot_dimension_numbers<[1], [0], [0], [1], [0, 0, 1, 1], [], []>} : vector<16x128xbf16>, vector<128x128xbf16>, vector<16x128xf32> -> vector<16x128xf32>
    %c0_24 = arith.constant 0 : index
    %c0_25 = arith.constant 0 : index
    %36 = vector.load %arg9[%c0_24, %c0_25] : memref<1x128xf32, #tpu.memory_space<vmem>>, vector<1x128xf32>
    %37 = vector.broadcast %36 : vector<1x128xf32> to vector<16x128xf32>
    %38 = arith.addf %35, %37 : vector<16x128xf32>
    %39 = arith.truncf %38 : vector<16x128xf32> to vector<16x128xbf16>
    %c0_26 = arith.constant 0 : index
    %c0_27 = arith.constant 0 : index
    %40 = vector.load %arg10[%c0_26, %c0_27] : memref<16x128xbf16, #tpu.memory_space<vmem>>, vector<16x128xbf16>
    tpu.vector_store %arg10[%c0_26, %c0_27], %39 {strides = array<i32>} : memref<16x128xbf16, #tpu.memory_space<vmem>>, vector<16x128xbf16>,
    return
  }
  func.func @transform_0(%arg0: i32) -> (i32, i32) {
    %c0_i32 = arith.constant 0 : i32
    %c0_i32_0 = arith.constant 0 : i32
    return %arg0, %c0_i32 : i32, i32
  }
  func.func @transform_1(%arg0: i32) -> (i32, i32) {
    %c0_i32 = arith.constant 0 : i32
    %c0_i32_0 = arith.constant 0 : i32
    %c0_i32_1 = arith.constant 0 : i32
    return %c0_i32, %c0_i32_0 : i32, i32
  }
  func.func @transform_2(%arg0: i32) -> (i32, i32) {
    %c0_i32 = arith.constant 0 : i32
    %c0_i32_0 = arith.constant 0 : i32
    %c0_i32_1 = arith.constant 0 : i32
    return %c0_i32, %c0_i32_0 : i32, i32
  }
  func.func @transform_3(%arg0: i32) -> (i32, i32) {
    %c0_i32 = arith.constant 0 : i32
    %c0_i32_0 = arith.constant 0 : i32
    %c0_i32_1 = arith.constant 0 : i32
    return %c0_i32, %c0_i32_0 : i32, i32
  }
  func.func @transform_4(%arg0: i32) -> (i32, i32) {
    %c0_i32 = arith.constant 0 : i32
    %c0_i32_0 = arith.constant 0 : i32
    %c0_i32_1 = arith.constant 0 : i32
    return %c0_i32, %c0_i32_0 : i32, i32
  }
  func.func @transform_5(%arg0: i32) -> (i32, i32) {
    %c0_i32 = arith.constant 0 : i32
    %c0_i32_0 = arith.constant 0 : i32
    %c0_i32_1 = arith.constant 0 : i32
    return %c0_i32, %c0_i32_0 : i32, i32
  }
  func.func @transform_6(%arg0: i32) -> (i32, i32) {
    %c0_i32 = arith.constant 0 : i32
    %c0_i32_0 = arith.constant 0 : i32
    %c0_i32_1 = arith.constant 0 : i32
    return %c0_i32, %c0_i32_0 : i32, i32
  }
  func.func @transform_7(%arg0: i32) -> (i32, i32) {
    %c0_i32 = arith.constant 0 : i32
    %c0_i32_0 = arith.constant 0 : i32
    %c0_i32_1 = arith.constant 0 : i32
    return %c0_i32, %c0_i32_0 : i32, i32
  }
  func.func @transform_8(%arg0: i32) -> (i32, i32) {
    %c0_i32 = arith.constant 0 : i32
    %c0_i32_0 = arith.constant 0 : i32
    %c0_i32_1 = arith.constant 0 : i32
    return %c0_i32, %c0_i32_0 : i32, i32
  }
  func.func @transform_9(%arg0: i32) -> (i32, i32) {
    %c0_i32 = arith.constant 0 : i32
    %c0_i32_0 = arith.constant 0 : i32
    return %arg0, %c0_i32 : i32, i32
  }
}

</mosaic_0001>

<bundles_post_ra>
// kernel: mlp_forward.1
= control target key start
LH: loop header
LB: loop body
LE: loop exit
PB: predicated region body
PF: predicated region fallthrough
CT: control target
= control target key end

     0   :  { %14 = vsyncpa [#allocation3], 0  ;;  %s1011_s0 = inlined_call_operand.vmem [shape: bf16[16,128], index: 0, kind: input, shape index: {}]   ;;  %s1012_s1 = inlined_call_operand.hbm [shape: bf16[128,128], index: 1, kind: input, shape index: {}]   ;;  %s1013_s2 = inlined_call_operand.vmem [shape: f32[1,128], index: 2, kind: input, shape index: {}]   ;;  %s1014_s3 = inlined_call_operand.hbm [shape: bf16[128,128], index: 3, kind: input, shape index: {}]   ;;  %s1015_s4 = inlined_call_operand.vmem [shape: f32[1,128], index: 4, kind: input, shape index: {}]   ;;  %s1016_s5 = inlined_call_operand.hbm [shape: bf16[128,128], index: 5, kind: input, shape index: {}]   ;;  %s1017_s6 = inlined_call_operand.vmem [shape: f32[1,128], index: 6, kind: input, shape index: {}]   ;;  %s1018_s7 = inlined_call_operand.hbm [shape: bf16[128,128], index: 7, kind: input, shape index: {}]   ;;  %s1019_s8 = inlined_call_operand.vmem [shape: f32[1,128], index: 8, kind: input, shape index: {}]   ;;  %s1020_s9 = inlined_call_operand.vmem [shape: bf16[16,128], index: 9, kind: output, shape index: {}]  }
   0x1   :  { %15 = vsyncpa [#allocation5], 0 }
   0x2   :  { %16 = vsyncpa [#allocation8], 0  ;;  %s871_s30 = smov [#allocation4]   ;;  %s872_s11 = smov [#allocation2]  }
   0x3   :  { %s38_s10 = sshll.u32 %s871_s30, 4  ;;  %s24_s12 = sshll.u32 %s872_s11, 4  ;;  %s39_s10 = int_to_ptr.vmem [resolvable:$true] %s38_s10  ;;  %s25_s12 = int_to_ptr.vmem [resolvable:$true] %s24_s12 }
   0x4   :  { %s793_s13 = scalar_lea.vmem %s39_s10, 1024  ;;  %p798_p1 = scmp.lt.s32.totalorder %s39_s10, %s39_s10 }
   0x5   :  { %p794_p0 = scmp.ne.s32.totalorder %s39_s10, %s793_s13  ;;  %p799_p2 = scmp.lt.s32.totalorder %s793_s13, %s793_s13 }
   0x7   :  { %p800_p3 = por %p799_p2, %p798_p1 }
   0x9   :  { %p801_p4 = pnand %p800_p3, %p794_p0 }
   0xb   :  { %804 = shalt.err (!%p801_p4)
}
   0xc   :  { %s873_s14 = smov 64   ;;  %s874_s15 = smov 4  }
   0xd   :  { %44 = dma.hbm_to_vmem [thread:$0]  %s1014_s3, 1024, %s39_s10, [#allocation5], %s873_s14, %s873_s14, %s874_s15  }
   0xe   :  { %s813_s18 = scalar_lea.vmem %s25_s12, 1024  ;;  %p818_p6 = scmp.lt.s32.totalorder %s25_s12, %s25_s12 }
   0xf   :  { %p814_p5 = scmp.ne.s32.totalorder %s25_s12, %s813_s18  ;;  %p819_p7 = scmp.lt.s32.totalorder %s813_s18, %s813_s18 }
  0x11   :  { %p820_p8 = por %p819_p7, %p818_p6 }
  0x13   :  { %p821_p9 = pnand %p820_p8, %p814_p5 }
  0x15   :  { %824 = shalt.err (!%p821_p9)
}
  0x16   :  { %30 = dma.hbm_to_vmem [thread:$0]  %s1012_s1, 1024, %s25_s12, [#allocation3], %s873_s14, %s873_s14, %s874_s15  }
  0x17   :  { %s875_s21 = smov [#allocation6]   ;;  %s876_s23 = smov [#allocation7]  }
  0x18   :  { %s52_s22 = sshll.u32 %s875_s21, 4  ;;  %s66_s24 = sshll.u32 %s876_s23, 4  ;;  %s53_s22 = int_to_ptr.vmem [resolvable:$true] %s52_s22  ;;  %s67_s24 = int_to_ptr.vmem [resolvable:$true] %s66_s24 }
  0x19   :  { %s833_s3 = scalar_lea.vmem %s53_s22, 1024  ;;  %p838_p11 = scmp.lt.s32.totalorder %s53_s22, %s53_s22 }
  0x1a   :  { %p834_p10 = scmp.ne.s32.totalorder %s53_s22, %s833_s3  ;;  %p839_p12 = scmp.lt.s32.totalorder %s833_s3, %s833_s3 }
  0x1c   :  { %p840_p13 = por %p839_p12, %p838_p11 }
  0x1e   :  { %p841_p0 = pnand %p840_p13, %p834_p10 }
  0x20   :  { %844 = shalt.err (!%p841_p0)
}
  0x21   :  { %58 = dma.hbm_to_vmem [thread:$0]  %s1016_s5, 1024, %s53_s22, [#allocation5], %s873_s14, %s873_s14, %s874_s15  }
  0x22   :  { %s853_s1 = scalar_lea.vmem %s67_s24, 1024  ;;  %p858_p2 = scmp.lt.s32.totalorder %s67_s24, %s67_s24 }
  0x23   :  { %p854_p1 = scmp.ne.s32.totalorder %s67_s24, %s853_s1  ;;  %p859_p3 = scmp.lt.s32.totalorder %s853_s1, %s853_s1 }
  0x25   :  { %p860_p4 = por %p859_p3, %p858_p2 }
  0x27   :  { %p861_p5 = pnand %p860_p4, %p854_p1 }
  0x29   :  { %864 = shalt.err (!%p861_p5)
}
  0x2a   :  { %72 = dma.hbm_to_vmem [thread:$0]  %s1018_s7, 1024, %s67_s24, [#allocation8], %s873_s14, %s873_s14, %s874_s15  }
  0x2b   :  { %865 = dma.done.wait [#allocation3], 1024  }
  0x2c   :  { %866 = vsyncadd [#allocation3], 4294966272 }
  0x2d   :  { %867 = dma.done.wait [#allocation5], 2048  }
  0x2e   :  { %868 = vsyncadd [#allocation5], 4294965248 }
  0x2f   :  { %869 = dma.done.wait [#allocation8], 1024  }
  0x30   :  { %870 = vsyncadd [#allocation8], 4294966272  ;;  %v877_v0 = vmov 0.0   ;;  %vm878_vm0 = vmmov 0   ;;  %v752_v1 = vld [vmem:[#allocation2 + $0x38] sm:$0xff]   ;;  %v753_v2 = vld [vmem:[#allocation2 + $0x30] sm:$0xff]  }
  0x31   :  { %664 = vmatprep.subr.bf16.mxu0 %v877_v0  ;;  %680 = vmatprep.mubr.msk.bf16.mxu0 %vm878_vm0, %v877_v0  ;;  %v754_v3 = vld [vmem:[#allocation2 + $0x28] sm:$0xff]   ;;  %v761_v4 = vld [vmem:[#allocation4 + $0x38] sm:$0xff]   ;;  %v755_v5 = vld [vmem:[#allocation2 + $0x20] sm:$0xff]  }
  0x32   :  { %684 = vmatprep.subr.bf16.mxu1 %v877_v0  ;;  %700 = vmatprep.mubr.msk.bf16.mxu1 %vm878_vm0, %v877_v0  ;;  %v762_v6 = vld [vmem:[#allocation4 + $0x30] sm:$0xff]   ;;  %v756_v7 = vld [vmem:[#allocation2 + $0x18] sm:$0xff]   ;;  %v763_v8 = vld [vmem:[#allocation4 + $0x28] sm:$0xff]  }
  0x33   :  { %665 = vmatpush3.bf16.msra.mxu0 %v752_v1  ;;  %685 = vmatpush3.bf16.msra.mxu1 %v761_v4  ;;  %v757_v9 = vld [vmem:[#allocation2 + $0x10] sm:$0xff]   ;;  %v764_v10 = vld [vmem:[#allocation4 + $0x20] sm:$0xff]   ;;  %v758_v11 = vld [vmem:[#allocation2 + $0x8] sm:$0xff]  }
  0x34   :  { %666 = vmatprep.subr.bf16.mxu0 %v877_v0  ;;  %686 = vmatprep.subr.bf16.mxu1 %v877_v0  ;;  %v765_v12 = vld [vmem:[#allocation4 + $0x18] sm:$0xff]   ;;  %v759_v13 = vld [vmem:[#allocation2] sm:$0xff]   ;;  %v766_v15 = vld [vmem:[#allocation4 + $0x10] sm:$0xff]  }
  0x35   :  { %v760_v14 = vld [vmem:[%s1011_s0] sm:$0xff]   ;;  %v767_v16 = vld [vmem:[#allocation4 + $0x8] sm:$0xff]   ;;  %v769_v18 = vld [vmem:[#allocation6 + $0x38] sm:$0xff]  }
  0x36   :  { %v768_v17 = vld [vmem:[#allocation4] sm:$0xff]   ;;  %v770_v19 = vld [vmem:[#allocation6 + $0x30] sm:$0xff]   ;;  %v771_v20 = vld [vmem:[#allocation6 + $0x28] sm:$0xff]  }
  0x37   :  { %667 = vmatpush3.bf16.msra.mxu0 %v753_v2  ;;  %687 = vmatpush3.bf16.msra.mxu1 %v762_v6  ;;  %v772_v21 = vld [vmem:[#allocation6 + $0x20] sm:$0xff]   ;;  %v773_v22 = vld [vmem:[#allocation6 + $0x18] sm:$0xff]   ;;  %v774_v35 = vld [vmem:[#allocation6 + $0x10] sm:$0xff]  }
  0x38   :  { %668 = vmatprep.subr.bf16.mxu0 %v877_v0  ;;  %688 = vmatprep.subr.bf16.mxu1 %v877_v0  ;;  %v582_v23 = vld [vmem:[%s1013_s2] ss:$0 sm:$0xff]  ;;  %v775_v36 = vld [vmem:[#allocation6 + $0x8] sm:$0xff]   ;;  %v777_v38 = vld [vmem:[#allocation7 + $0x38] sm:$0xff]  }
  0x39   :  { %v776_v37 = vld [vmem:[#allocation6] sm:$0xff]   ;;  %v778_v39 = vld [vmem:[#allocation7 + $0x30] sm:$0xff]   ;;  %v779_v40 = vld [vmem:[#allocation7 + $0x28] sm:$0xff]  }
  0x3a   :  { %v780_v41 = vld [vmem:[#allocation7 + $0x20] sm:$0xff]   ;;  %v781_v42 = vld [vmem:[#allocation7 + $0x18] sm:$0xff]   ;;  %v782_v55 = vld [vmem:[#allocation7 + $0x10] sm:$0xff]  }
  0x3b   :  { %669 = vmatpush3.bf16.msra.mxu0 %v754_v3  ;;  %689 = vmatpush3.bf16.msra.mxu1 %v763_v8  ;;  %v592_v43 = vld [vmem:[%s1015_s4] ss:$0 sm:$0xff]  ;;  %v783_v56 = vld [vmem:[#allocation7 + $0x8] sm:$0xff]  }
  0x3c   :  { %670 = vmatprep.subr.bf16.mxu0 %v877_v0  ;;  %690 = vmatprep.subr.bf16.mxu1 %v877_v0  ;;  %v784_v57 = vld [vmem:[#allocation7] sm:$0xff]  }
  0x3d   :  { %v601_v58 = vld [vmem:[%s1017_s6] ss:$0 sm:$0xff] }
  0x3f   :  { %671 = vmatpush3.bf16.msra.mxu0 %v755_v5  ;;  %691 = vmatpush3.bf16.msra.mxu1 %v764_v10 }
  0x40   :  { %672 = vmatprep.subr.bf16.mxu0 %v877_v0  ;;  %692 = vmatprep.subr.bf16.mxu1 %v877_v0 }
  0x43   :  { %673 = vmatpush3.bf16.msra.mxu0 %v756_v7  ;;  %693 = vmatpush3.bf16.msra.mxu1 %v765_v12  ;;  %v610_v7 = vld [vmem:[%s1019_s8] ss:$0 sm:$0xff] }
  0x44   :  { %674 = vmatprep.subr.bf16.mxu0 %v877_v0  ;;  %694 = vmatprep.subr.bf16.mxu1 %v877_v0 }
  0x47   :  { %675 = vmatpush3.bf16.msra.mxu0 %v757_v9  ;;  %695 = vmatpush3.bf16.msra.mxu1 %v766_v15 }
  0x48   :  { %676 = vmatprep.subr.bf16.mxu0 %v877_v0  ;;  %696 = vmatprep.subr.bf16.mxu1 %v877_v0 }
  0x4b   :  { %677 = vmatpush3.bf16.msra.mxu0 %v758_v11  ;;  %697 = vmatpush3.bf16.msra.mxu1 %v767_v16 }
  0x4c   :  { %678 = vmatprep.subr.bf16.mxu0 %v877_v0  ;;  %698 = vmatprep.subr.bf16.mxu1 %v877_v0 }
  0x4f   :  { %679 = vmatpush3.bf16.msra.mxu0 %v759_v13  ;;  %699 = vmatpush3.bf16.msra.mxu1 %v768_v17 }
  0x50   :  { %704 = vmatprep.subr.bf16.mxu0 %v877_v0  ;;  %724 = vmatprep.subr.bf16.mxu1 %v877_v0 }
  0x52   :  { %681 = vmatmul.mubr.bf16.vlgmr.msra.gmra.mxu0 %v760_v14 }
  0x53   :  { %720 = vmatprep.mubr.msk.bf16.mxu0 %vm878_vm0, %v877_v0  ;;  %705 = vmatpush3.bf16.msra.mxu0 %v769_v18 }
  0x54   :  { %706 = vmatprep.subr.bf16.mxu0 %v877_v0 }
  0x57   :  { %707 = vmatpush3.bf16.msra.mxu0 %v770_v19 }
  0x58   :  { %708 = vmatprep.subr.bf16.mxu0 %v877_v0 }
  0x5b   :  { %709 = vmatpush3.bf16.msra.mxu0 %v771_v20 }
  0x5c   :  { %710 = vmatprep.subr.bf16.mxu0 %v877_v0 }
  0x5f   :  { %711 = vmatpush3.bf16.msra.mxu0 %v772_v21 }
  0x60   :  { %712 = vmatprep.subr.bf16.mxu0 %v877_v0 }
  0x63   :  { %713 = vmatpush3.bf16.msra.mxu0 %v773_v22 }
  0x64   :  { %714 = vmatprep.subr.bf16.mxu0 %v877_v0 }
  0x67   :  { %715 = vmatpush3.bf16.msra.mxu0 %v774_v35 }
  0x68   :  { %716 = vmatprep.subr.bf16.mxu0 %v877_v0 }
  0x6b   :  { %717 = vmatpush3.bf16.msra.mxu0 %v775_v36 }
  0x6c   :  { %718 = vmatprep.subr.bf16.mxu0 %v877_v0 }
  0x6f   :  { %719 = vmatpush3.bf16.msra.mxu0 %v776_v37 }
 0x112   :  { %v201_v24 = vpop.f32.mrf.mxu0 }
 0x113   :  { %v202_v25 = vadd.f32 %v582_v23, %v201_v24 }
 0x114   :  { %v682_v26 = vpop.f32.mrf.mxu0 }
 0x115   :  { %v210_v28 = vmul.f32 0.01, %v202_v25  ;;  %vm208_vm1 = vcmp.gt.f32.partialorder %v202_v25, 0.0 }
 0x116   :  { %v204_v27 = vpop.f32.mrf.mxu0 }
 0x117   :  { %v205_v29 = vadd.f32 %v582_v23, %v204_v27  ;;  %v212_v32 = vsel %vm208_vm1, %v202_v25, %v210_v28 }
 0x118   :  { %v683_v30 = vpop.f32.mrf.mxu0 }
 0x119   :  { %vm209_vm2 = vcmp.gt.f32.partialorder %v205_v29, 0.0  ;;  %v211_v31 = vmul.f32 0.01, %v205_v29 }
 0x11b   :  { %v213_v33 = vsel %vm209_vm2, %v205_v29, %v211_v31 }
 0x11c   :  { %v214_v34 = vpack.c.bf16 %v213_v33, %v212_v32 }
 0x11e   :  { %701 = vmatmul.mubr.bf16.vlgmr.msra.gmra.mxu1 %v214_v34 }
 0x11f   :  { %740 = vmatprep.mubr.msk.bf16.mxu1 %vm878_vm0, %v877_v0  ;;  %725 = vmatpush3.bf16.msra.mxu1 %v777_v38 }
 0x120   :  { %726 = vmatprep.subr.bf16.mxu1 %v877_v0 }
 0x123   :  { %727 = vmatpush3.bf16.msra.mxu1 %v778_v39 }
 0x124   :  { %728 = vmatprep.subr.bf16.mxu1 %v877_v0 }
 0x127   :  { %729 = vmatpush3.bf16.msra.mxu1 %v779_v40 }
 0x128   :  { %730 = vmatprep.subr.bf16.mxu1 %v877_v0 }
 0x12b   :  { %731 = vmatpush3.bf16.msra.mxu1 %v780_v41 }
 0x12c   :  { %732 = vmatprep.subr.bf16.mxu1 %v877_v0 }
 0x12f   :  { %733 = vmatpush3.bf16.msra.mxu1 %v781_v42 }
 0x130   :  { %734 = vmatprep.subr.bf16.mxu1 %v877_v0 }
 0x133   :  { %735 = vmatpush3.bf16.msra.mxu1 %v782_v55 }
 0x134   :  { %736 = vmatprep.subr.bf16.mxu1 %v877_v0 }
 0x137   :  { %737 = vmatpush3.bf16.msra.mxu1 %v783_v56 }
 0x138   :  { %738 = vmatprep.subr.bf16.mxu1 %v877_v0 }
 0x13b   :  { %739 = vmatpush3.bf16.msra.mxu1 %v784_v57 }
 0x1de   :  { %v320_v44 = vpop.f32.mrf.mxu1 }
 0x1df   :  { %v321_v45 = vadd.f32 %v592_v43, %v320_v44 }
 0x1e0   :  { %v702_v46 = vpop.f32.mrf.mxu1 }
 0x1e1   :  { %v329_v48 = vmul.f32 0.01, %v321_v45  ;;  %vm327_vm3 = vcmp.gt.f32.partialorder %v321_v45, 0.0 }
 0x1e2   :  { %v323_v47 = vpop.f32.mrf.mxu1 }
 0x1e3   :  { %v324_v49 = vadd.f32 %v592_v43, %v323_v47  ;;  %v331_v52 = vsel %vm327_vm3, %v321_v45, %v329_v48 }
 0x1e4   :  { %v703_v50 = vpop.f32.mrf.mxu1 }
 0x1e5   :  { %vm328_vm4 = vcmp.gt.f32.partialorder %v324_v49, 0.0  ;;  %v330_v51 = vmul.f32 0.01, %v324_v49 }
 0x1e7   :  { %v332_v53 = vsel %vm328_vm4, %v324_v49, %v330_v51 }
 0x1e8   :  { %v333_v54 = vpack.c.bf16 %v332_v53, %v331_v52 }
 0x1ea   :  { %721 = vmatmul.mubr.bf16.vlgmr.msra.gmra.mxu0 %v333_v54 }
 0x2aa   :  { %v439_v59 = vpop.f32.mrf.mxu0 }
 0x2ab   :  { %v440_v60 = vadd.f32 %v601_v58, %v439_v59 }
 0x2ac   :  { %v722_v61 = vpop.f32.mrf.mxu0 }
 0x2ad   :  { %v448_v63 = vmul.f32 0.01, %v440_v60  ;;  %vm446_vm5 = vcmp.gt.f32.partialorder %v440_v60, 0.0 }
 0x2ae   :  { %v442_v62 = vpop.f32.mrf.mxu0 }
 0x2af   :  { %v443_v1 = vadd.f32 %v601_v58, %v442_v62  ;;  %v450_v4 = vsel %vm446_vm5, %v440_v60, %v448_v63 }
 0x2b0   :  { %v723_v2 = vpop.f32.mrf.mxu0 }
 0x2b1   :  { %vm447_vm6 = vcmp.gt.f32.partialorder %v443_v1, 0.0  ;;  %v449_v3 = vmul.f32 0.01, %v443_v1 }
 0x2b3   :  { %v451_v5 = vsel %vm447_vm6, %v443_v1, %v449_v3 }
 0x2b4   :  { %v452_v6 = vpack.c.bf16 %v451_v5, %v450_v4 }
 0x2b6   :  { %741 = vmatmul.mubr.bf16.vlgmr.msra.gmra.mxu1 %v452_v6 }
 0x376   :  { %v558_v0 = vpop.f32.mrf.mxu1 }
 0x377   :  { %v559_v10 = vadd.f32 %v610_v7, %v558_v0 }
 0x378   :  { %v742_v8 = vpop.f32.mrf.mxu1 }
 0x37a   :  { %v561_v9 = vpop.f32.mrf.mxu1 }
 0x37b   :  { %v562_v11 = vadd.f32 %v610_v7, %v561_v9 }
 0x37c   :  { %v743_v12 = vpop.f32.mrf.mxu1 }
 0x37d   :  { %v626_v13 = vpack.c.bf16 %v562_v11, %v559_v10 }
 0x37f   :  { %627 = vst [vmem:[%s1020_s9] sm:$0xff] %v626_v13  }
 0x380   :  { %579 = vsyncpa [#allocation3], 1 }
 0x381   :  { %580 = vsyncpa [#allocation5], 1 }
 0x382   :  { %581 = vsyncpa [#allocation8], 1 }

</bundles_post_ra>
